<compile_context>
chip_gen: v7x
topology: tpu7x:2x2x1
jax: 0.10.0
libtpu: 0.0.40
codegen_flags: <defaults>
</compile_context>

<pallas_src>
import functools

import jax
import jax.numpy as jnp
from jax import lax
from jax.experimental import pallas as pl
from jax.experimental.pallas import tpu as pltpu


def resblock_kernel(x_ref, w1_ref, w2_ref, bn_ref, mask_ref, o_ref, *, wp):
    # x_ref   : (Cp, Mx)   f32  flattened zero-ringed input plane + 2G margins
    # w1_ref  : (Cp, 9*Cp) bf16 im2col conv1 weights  (K order: [kh, kw, cin])
    # w2_ref  : (Cp, 9*Cp) bf16 im2col conv2 weights
    # bn_ref  : (Cp, 4)    f32  columns: scale1, shift1, scale2, shift2
    # mask_ref: (1, L)     f32  1.0 on interior pixels, 0.0 on ring/margins
    # o_ref   : (Cp, P)    f32  output on the padded flat grid (P = Hp*Wp)
    g = wp + 1                       # max |tap shift| = Wp + 1
    l = mask_ref.shape[1]            # extended grid length  = P + 2*G
    p = o_ref.shape[1]               # padded plane length   = Hp*Wp

    # tap shift in the flattened padded coordinate system
    shifts = [(kh - 1) * wp + (kw - 1) for kh in range(3) for kw in range(3)]

    x = x_ref[...]                                            # (Cp, Mx) f32

    # ---- conv1 as a single fused im2col matmul (lane-dense result) --------
    patch1 = jnp.concatenate([x[:, g + s: g + s + l] for s in shifts], axis=0)
    y1 = lax.dot_general(
        w1_ref[...], patch1.astype(jnp.bfloat16),
        dimension_numbers=(((1,), (0,)), ((), ())),
        preferred_element_type=jnp.float32)                   # (Cp, L)
    # bn1 + relu, then zero the padding ring & margins (they are conv2's
    # zero-padding and must stay exactly 0 after the affine shift).
    y1 = y1 * bn_ref[:, 0:1] + bn_ref[:, 1:2]
    y1 = jnp.maximum(y1, 0.0) * mask_ref[...]

    # ---- conv2 as a single fused im2col matmul -----------------------------
    patch2 = jnp.concatenate([y1[:, g + s: g + s + p] for s in shifts], axis=0)
    y2 = lax.dot_general(
        w2_ref[...], patch2.astype(jnp.bfloat16),
        dimension_numbers=(((1,), (0,)), ((), ())),
        preferred_element_type=jnp.float32)                   # (Cp, P)
    y2 = y2 * bn_ref[:, 2:3] + bn_ref[:, 3:4]

    # ---- residual add (identity kept in f32) + final relu ------------------
    identity = x[:, 2 * g: 2 * g + p]                         # (Cp, P)
    o_ref[...] = jnp.maximum(y2 + identity, 0.0).astype(o_ref.dtype)


def resblock(x, w1_oihw, w2_oihw, bn1, bn2, eps=1e-5):
    """x: (N, C, H, W) f32; w*: (C, C, 3, 3) OIHW; bn* = (gamma, beta, mean, var)."""
    N, Cin, H, W = x.shape
    Cout = w1_oihw.shape[0]
    assert Cin == Cout, "identity path requires matching channels (downsample=None)"

    Cp = max(8, ((Cout + 7) // 8) * 8)      # pad channels to a sublane multiple
    Hp, Wp = H + 2, W + 2
    P = Hp * Wp                              # padded plane, flattened
    G = Wp + 1                               # max |3x3 tap shift|
    L = P + 2 * G                            # extended conv1 output grid
    Mx = P + 4 * G                           # input with margins for conv1 taps

    # ---- fold BatchNorm (inference) into per-channel scale / shift ---------
    g1, b1, m1, v1 = bn1
    g2, b2, m2, v2 = bn2
    s1 = g1 / jnp.sqrt(v1 + eps)
    t1 = b1 - m1 * s1
    s2 = g2 / jnp.sqrt(v2 + eps)
    t2 = b2 - m2 * s2
    padc = lambda v: jnp.pad(v, (0, Cp - Cout))
    bn = jnp.stack([padc(s1), padc(t1), padc(s2), padc(t2)],
                   axis=1).astype(jnp.float32)                     # (Cp, 4)

    # ---- im2col weight packing: (Cout,Cin,3,3) -> (Cp, 9*Cp) bf16 ----------
    def pack_w(w):
        wpad = jnp.pad(w, ((0, Cp - w.shape[0]), (0, Cp - w.shape[1]),
                           (0, 0), (0, 0)))
        return jnp.transpose(wpad, (0, 2, 3, 1)).reshape(Cp, 9 * Cp).astype(
            jnp.bfloat16)
    w1k = pack_w(w1_oihw)
    w2k = pack_w(w2_oihw)

    # ---- lane-dense input: zero channel pad, zero spatial ring, flatten,
    #      and add 2G margins so all 9 tap slices are in-bounds --------------
    xp = jnp.pad(x, ((0, 0), (0, Cp - Cin), (1, 1), (1, 1)))
    x_ext = jnp.pad(xp.reshape(N, Cp, P),
                    ((0, 0), (0, 0), (2 * G, 2 * G))).astype(jnp.float32)

    # interior mask over the extended flat grid
    m = jnp.arange(L) - G
    row, col = m // Wp, m % Wp
    interior = (row >= 1) & (row <= H) & (col >= 1) & (col <= W)
    mask = interior.astype(jnp.float32).reshape(1, L)

    kern = functools.partial(resblock_kernel, wp=Wp)
    out_flat = pl.pallas_call(
        kern,
        out_shape=jax.ShapeDtypeStruct((N, Cp, P), jnp.float32),
        grid_spec=pltpu.PrefetchScalarGridSpec(
            num_scalar_prefetch=0,
            grid=(N,),
            in_specs=[
                pl.BlockSpec((None, Cp, Mx), lambda n: (n, 0, 0)),
                pl.BlockSpec((Cp, 9 * Cp), lambda n: (0, 0)),
                pl.BlockSpec((Cp, 9 * Cp), lambda n: (0, 0)),
                pl.BlockSpec((Cp, 4), lambda n: (0, 0)),
                pl.BlockSpec((1, L), lambda n: (0, 0)),
            ],
            out_specs=pl.BlockSpec((None, Cp, P), lambda n: (n, 0, 0)),
        ),
        compiler_params=pltpu.CompilerParams(
            dimension_semantics=("parallel",)),
    )(x_ext, w1k, w2k, bn, mask)

    # output is already channel-major (NCHW); just un-pad channels & ring.
    out = out_flat.reshape(N, Cp, Hp, Wp)[:, :Cout, 1:H + 1, 1:W + 1]
    return out


def resblock_reference(x, w1, w2, bn1, bn2, eps=1e-5):
    """Pure-JAX f32 reference matching the PyTorch ResBlock forward (eval BN)."""
    g1, b1, m1, v1 = bn1
    g2, b2, m2, v2 = bn2
    dn = ("NCHW", "OIHW", "NCHW")
    bcast = lambda v: v[None, :, None, None]

    y = lax.conv_general_dilated(x, w1, (1, 1), ((1, 1), (1, 1)),
                                 dimension_numbers=dn)
    y = (y - bcast(m1)) * bcast(g1 / jnp.sqrt(v1 + eps)) + bcast(b1)
    y = jnp.maximum(y, 0.0)
    y = lax.conv_general_dilated(y, w2, (1, 1), ((1, 1), (1, 1)),
                                 dimension_numbers=dn)
    y = (y - bcast(m2)) * bcast(g2 / jnp.sqrt(v2 + eps)) + bcast(b2)
    return jnp.maximum(y + x, 0.0)


if __name__ == "__main__":
    key = jax.random.PRNGKey(0)
    N, C, H, W = 2, 4, 16, 16            # in_channels == out_channels, stride=1
    ks = jax.random.split(key, 11)

    x = jax.random.normal(ks[0], (N, C, H, W), dtype=jnp.float32)
    bound = (1.0 / (C * 9)) ** 0.5       # kaiming-uniform-ish bound
    w1 = jax.random.uniform(ks[1], (C, C, 3, 3), jnp.float32, -bound, bound)
    w2 = jax.random.uniform(ks[2], (C, C, 3, 3), jnp.float32, -bound, bound)

    bn1 = (jax.random.uniform(ks[3], (C,), jnp.float32, 0.8, 1.2),   # gamma
           jax.random.uniform(ks[4], (C,), jnp.float32, -0.2, 0.2),  # beta
           jax.random.uniform(ks[5], (C,), jnp.float32, -0.1, 0.1),  # running_mean
           jax.random.uniform(ks[6], (C,), jnp.float32, 0.5, 1.5))   # running_var
    bn2 = (jax.random.uniform(ks[7], (C,), jnp.float32, 0.8, 1.2),
           jax.random.uniform(ks[8], (C,), jnp.float32, -0.2, 0.2),
           jax.random.uniform(ks[9], (C,), jnp.float32, -0.1, 0.1),
           jax.random.uniform(ks[10], (C,), jnp.float32, 0.5, 1.5))

    out = resblock(x, w1, w2, bn1, bn2)
    out = jax.block_until_ready(out)

    ref = resblock_reference(x, w1, w2, bn1, bn2)
    assert out.shape == (N, C, H, W)
    # bf16 matmul operands (f32 accumulation) -> loosened tolerance vs f32 ref.
    assert jnp.allclose(out, ref, atol=2e-2, rtol=2e-2)

    print("KERNEL_OK")
</pallas_src>

<mosaic_0001>
module attributes {stable_mosaic.version = 11 : i64} {
  func.func @resblock_kernel(%arg0: i32, %arg1: memref<1x8x400xf32, #tpu.memory_space<vmem>>, %arg2: memref<8x72xbf16, #tpu.memory_space<vmem>>, %arg3: memref<8x72xbf16, #tpu.memory_space<vmem>>, %arg4: memref<8x4xf32, #tpu.memory_space<vmem>>, %arg5: memref<1x362xf32, #tpu.memory_space<vmem>>, %arg6: memref<1x8x324xf32, #tpu.memory_space<vmem>>) attributes {dimension_semantics = [#tpu.dimension_semantics<parallel>], iteration_bounds = array<i64: 2>, scalar_prefetch = 0 : i64, scratch_operands = 0 : i64, tpu.core_type = #tpu.core_type<tc>, window_params = [{transform_indices = @transform_0, window_bounds = array<i64: 1, 8, 400>}, {pipeline_mode = #tpu.pipeline_mode<synchronous>, transform_indices = @transform_1, window_bounds = array<i64: 8, 72>}, {pipeline_mode = #tpu.pipeline_mode<synchronous>, transform_indices = @transform_2, window_bounds = array<i64: 8, 72>}, {pipeline_mode = #tpu.pipeline_mode<synchronous>, transform_indices = @transform_3, window_bounds = array<i64: 8, 4>}, {pipeline_mode = #tpu.pipeline_mode<synchronous>, transform_indices = @transform_4, window_bounds = array<i64: 1, 362>}, {transform_indices = @transform_5, window_bounds = array<i64: 1, 8, 324>}]} {
    %c0 = arith.constant 0 : index
    %c0_0 = arith.constant 0 : index
    %c0_1 = arith.constant 0 : index
    %0 = vector.load %arg1[%c0, %c0_0, %c0_1] : memref<1x8x400xf32, #tpu.memory_space<vmem>>, vector<1x8x400xf32>
    %1 = vector.shape_cast %0 : vector<1x8x400xf32> to vector<8x400xf32>
    %2 = vector.extract_strided_slice %1 {offsets = [0, 0], sizes = [8, 362], strides = [1, 1]} : vector<8x400xf32> to vector<8x362xf32>
    %3 = vector.extract_strided_slice %1 {offsets = [0, 1], sizes = [8, 362], strides = [1, 1]} : vector<8x400xf32> to vector<8x362xf32>
    %4 = vector.extract_strided_slice %1 {offsets = [0, 2], sizes = [8, 362], strides = [1, 1]} : vector<8x400xf32> to vector<8x362xf32>
    %5 = vector.extract_strided_slice %1 {offsets = [0, 18], sizes = [8, 362], strides = [1, 1]} : vector<8x400xf32> to vector<8x362xf32>
    %6 = vector.extract_strided_slice %1 {offsets = [0, 19], sizes = [8, 362], strides = [1, 1]} : vector<8x400xf32> to vector<8x362xf32>
    %7 = vector.extract_strided_slice %1 {offsets = [0, 20], sizes = [8, 362], strides = [1, 1]} : vector<8x400xf32> to vector<8x362xf32>
    %8 = vector.extract_strided_slice %1 {offsets = [0, 36], sizes = [8, 362], strides = [1, 1]} : vector<8x400xf32> to vector<8x362xf32>
    %9 = vector.extract_strided_slice %1 {offsets = [0, 37], sizes = [8, 362], strides = [1, 1]} : vector<8x400xf32> to vector<8x362xf32>
    %10 = vector.extract_strided_slice %1 {offsets = [0, 38], sizes = [8, 362], strides = [1, 1]} : vector<8x400xf32> to vector<8x362xf32>
    %11 = tpu.concatenate %2, %3, %4, %5, %6, %7, %8, %9, %10 in 0 : vector<8x362xf32>, vector<8x362xf32>, vector<8x362xf32>, vector<8x362xf32>, vector<8x362xf32>, vector<8x362xf32>, vector<8x362xf32>, vector<8x362xf32>, vector<8x362xf32> -> vector<72x362xf32>
    %c0_2 = arith.constant 0 : index
    %c0_3 = arith.constant 0 : index
    %12 = vector.load %arg2[%c0_2, %c0_3] : memref<8x72xbf16, #tpu.memory_space<vmem>>, vector<8x72xbf16>
    %13 = arith.truncf %11 : vector<72x362xf32> to vector<72x362xbf16>
    %cst = arith.constant dense<0.000000e+00> : vector<8x362xf32>
    %14 = tpu.matmul %12, %13, %cst {dimension_numbers = #tpu.dot_dimension_numbers<[1], [0], [0], [1], [0, 0, 1, 1], [], []>} : vector<8x72xbf16>, vector<72x362xbf16>, vector<8x362xf32> -> vector<8x362xf32>
    %c0_4 = arith.constant 0 : index
    %c0_5 = arith.constant 0 : index
    %15 = vector.load %arg4[%c0_4, %c0_5] : memref<8x4xf32, #tpu.memory_space<vmem>>, vector<8x1xf32>
    %16 = vector.broadcast %15 : vector<8x1xf32> to vector<8x362xf32>
    %17 = arith.mulf %14, %16 : vector<8x362xf32>
    %c0_6 = arith.constant 0 : index
    %c1 = arith.constant 1 : index
    %18 = vector.load %arg4[%c0_6, %c1] : memref<8x4xf32, #tpu.memory_space<vmem>>, vector<8x1xf32>
    %19 = vector.broadcast %18 : vector<8x1xf32> to vector<8x362xf32>
    %20 = arith.addf %17, %19 : vector<8x362xf32>
    %cst_7 = arith.constant 0.000000e+00 : f32
    %21 = vector.broadcast %cst_7 : f32 to vector<8x362xf32>
    %22 = arith.maximumf %20, %21 : vector<8x362xf32>
    %c0_8 = arith.constant 0 : index
    %c0_9 = arith.constant 0 : index
    %23 = vector.load %arg5[%c0_8, %c0_9] : memref<1x362xf32, #tpu.memory_space<vmem>>, vector<1x362xf32>
    %24 = vector.broadcast %23 : vector<1x362xf32> to vector<8x362xf32>
    %25 = arith.mulf %22, %24 : vector<8x362xf32>
    %26 = vector.extract_strided_slice %25 {offsets = [0, 0], sizes = [8, 324], strides = [1, 1]} : vector<8x362xf32> to vector<8x324xf32>
    %27 = vector.extract_strided_slice %25 {offsets = [0, 1], sizes = [8, 324], strides = [1, 1]} : vector<8x362xf32> to vector<8x324xf32>
    %28 = vector.extract_strided_slice %25 {offsets = [0, 2], sizes = [8, 324], strides = [1, 1]} : vector<8x362xf32> to vector<8x324xf32>
    %29 = vector.extract_strided_slice %25 {offsets = [0, 18], sizes = [8, 324], strides = [1, 1]} : vector<8x362xf32> to vector<8x324xf32>
    %30 = vector.extract_strided_slice %25 {offsets = [0, 19], sizes = [8, 324], strides = [1, 1]} : vector<8x362xf32> to vector<8x324xf32>
    %31 = vector.extract_strided_slice %25 {offsets = [0, 20], sizes = [8, 324], strides = [1, 1]} : vector<8x362xf32> to vector<8x324xf32>
    %32 = vector.extract_strided_slice %25 {offsets = [0, 36], sizes = [8, 324], strides = [1, 1]} : vector<8x362xf32> to vector<8x324xf32>
    %33 = vector.extract_strided_slice %25 {offsets = [0, 37], sizes = [8, 324], strides = [1, 1]} : vector<8x362xf32> to vector<8x324xf32>
    %34 = vector.extract_strided_slice %25 {offsets = [0, 38], sizes = [8, 324], strides = [1, 1]} : vector<8x362xf32> to vector<8x324xf32>
    %35 = tpu.concatenate %26, %27, %28, %29, %30, %31, %32, %33, %34 in 0 : vector<8x324xf32>, vector<8x324xf32>, vector<8x324xf32>, vector<8x324xf32>, vector<8x324xf32>, vector<8x324xf32>, vector<8x324xf32>, vector<8x324xf32>, vector<8x324xf32> -> vector<72x324xf32>
    %c0_10 = arith.constant 0 : index
    %c0_11 = arith.constant 0 : index
    %36 = vector.load %arg3[%c0_10, %c0_11] : memref<8x72xbf16, #tpu.memory_space<vmem>>, vector<8x72xbf16>
    %37 = arith.truncf %35 : vector<72x324xf32> to vector<72x324xbf16>
    %cst_12 = arith.constant dense<0.000000e+00> : vector<8x324xf32>
    %38 = tpu.matmul %36, %37, %cst_12 {dimension_numbers = #tpu.dot_dimension_numbers<[1], [0], [0], [1], [0, 0, 1, 1], [], []>} : vector<8x72xbf16>, vector<72x324xbf16>, vector<8x324xf32> -> vector<8x324xf32>
    %c0_13 = arith.constant 0 : index
    %c2 = arith.constant 2 : index
    %39 = vector.load %arg4[%c0_13, %c2] : memref<8x4xf32, #tpu.memory_space<vmem>>, vector<8x1xf32>
    %40 = vector.broadcast %39 : vector<8x1xf32> to vector<8x324xf32>
    %41 = arith.mulf %38, %40 : vector<8x324xf32>
    %c0_14 = arith.constant 0 : index
    %c3 = arith.constant 3 : index
    %42 = vector.load %arg4[%c0_14, %c3] : memref<8x4xf32, #tpu.memory_space<vmem>>, vector<8x1xf32>
    %43 = vector.broadcast %42 : vector<8x1xf32> to vector<8x324xf32>
    %44 = arith.addf %41, %43 : vector<8x324xf32>
    %45 = vector.extract_strided_slice %1 {offsets = [0, 38], sizes = [8, 324], strides = [1, 1]} : vector<8x400xf32> to vector<8x324xf32>
    %46 = arith.addf %44, %45 : vector<8x324xf32>
    %cst_15 = arith.constant 0.000000e+00 : f32
    %47 = vector.broadcast %cst_15 : f32 to vector<8x324xf32>
    %48 = arith.maximumf %46, %47 : vector<8x324xf32>
    %c0_16 = arith.constant 0 : index
    %c0_17 = arith.constant 0 : index
    %c0_18 = arith.constant 0 : index
    %49 = vector.load %arg6[%c0_16, %c0_17, %c0_18] : memref<1x8x324xf32, #tpu.memory_space<vmem>>, vector<1x8x324xf32>
    %50 = vector.shape_cast %49 : vector<1x8x324xf32> to vector<8x324xf32>
    %51 = vector.shape_cast %48 : vector<8x324xf32> to vector<1x8x324xf32>
    tpu.vector_store %arg6[%c0_16, %c0_17, %c0_18], %51 {strides = array<i32>} : memref<1x8x324xf32, #tpu.memory_space<vmem>>, vector<1x8x324xf32>,
    return
  }
  func.func @transform_0(%arg0: i32) -> (i32, i32, i32) {
    %c0_i32 = arith.constant 0 : i32
    %c0_i32_0 = arith.constant 0 : i32
    %c0_i32_1 = arith.constant 0 : i32
    return %arg0, %c0_i32, %c0_i32_0 : i32, i32, i32
  }
  func.func @transform_1(%arg0: i32) -> (i32, i32) {
    %c0_i32 = arith.constant 0 : i32
    %c0_i32_0 = arith.constant 0 : i32
    %c0_i32_1 = arith.constant 0 : i32
    return %c0_i32, %c0_i32_0 : i32, i32
  }
  func.func @transform_2(%arg0: i32) -> (i32, i32) {
    %c0_i32 = arith.constant 0 : i32
    %c0_i32_0 = arith.constant 0 : i32
    %c0_i32_1 = arith.constant 0 : i32
    return %c0_i32, %c0_i32_0 : i32, i32
  }
  func.func @transform_3(%arg0: i32) -> (i32, i32) {
    %c0_i32 = arith.constant 0 : i32
    %c0_i32_0 = arith.constant 0 : i32
    %c0_i32_1 = arith.constant 0 : i32
    return %c0_i32, %c0_i32_0 : i32, i32
  }
  func.func @transform_4(%arg0: i32) -> (i32, i32) {
    %c0_i32 = arith.constant 0 : i32
    %c0_i32_0 = arith.constant 0 : i32
    %c0_i32_1 = arith.constant 0 : i32
    return %c0_i32, %c0_i32_0 : i32, i32
  }
  func.func @transform_5(%arg0: i32) -> (i32, i32, i32) {
    %c0_i32 = arith.constant 0 : i32
    %c0_i32_0 = arith.constant 0 : i32
    %c0_i32_1 = arith.constant 0 : i32
    return %arg0, %c0_i32, %c0_i32_0 : i32, i32, i32
  }
}

</mosaic_0001>

<bundles_post_ra>
// kernel: tpu_custom_call.1
= control target key start
LH: loop header
LB: loop body
LE: loop exit
PB: predicated region body
PF: predicated region fallthrough
CT: control target
= control target key end

     0   :  { %10 = vsyncpa [#allocation3], 0  ;;  %s1459_s0 = inlined_call_operand.hbm [shape: f32[2,8,400], index: 0, kind: input, shape index: {}]   ;;  %s1460_s1 = inlined_call_operand.vmem [shape: bf16[8,72], index: 1, kind: input, shape index: {}]   ;;  %s1461_s2 = inlined_call_operand.vmem [shape: bf16[8,72], index: 2, kind: input, shape index: {}]   ;;  %s1462_s3 = inlined_call_operand.vmem [shape: f32[8,4], index: 3, kind: input, shape index: {}]   ;;  %s1463_s4 = inlined_call_operand.vmem [shape: f32[1,362], index: 4, kind: input, shape index: {}]   ;;  %s1464_s5 = inlined_call_operand.hbm [shape: f32[2,8,324], index: 5, kind: output, shape index: {}]  }
   0x1   :  { %12 = vsyncpa [#allocation3 + $0x1], 0 }
   0x2   :  { %13 = vsyncpa [#allocation4], 0 }
   0x3   :  { %15 = vsyncpa [#allocation4 + $0x1], 0  ;;  %s1168_s18 = smov 0   ;;  %s1170_s19 = smov 0  }
   0x4   :  { %s1172_s20 = smov 0   ;;  %s1174_s21 = smov 0  }
   0x5 LB: > { %s1189_s22 = sadd.s32 4294967295, %s1120_s21   ;;  %s815_s23 = sadd.s32 4294967294, %s1120_s21   ;;  %s1120_s21 = sphi %s1174_s21, %s1479_s21   ;;  %s1116_s20 = sphi %s1172_s20, %s1478_s20   ;;  %s1112_s19 = sphi %s1170_s19, %s1477_s19   ;;  %s1108_s18 = sphi %s1168_s18, %s1476_s18  }
   0x6   : > { %s1193_s24 = sadd.s32 1, %s1120_s21   ;;  %s28_s25 = sadd.s32 1, %s1116_s20 }
   0x7   : > { %s25_s26 = ssub.s32 %s1120_s21, %s1193_s24  ;;  %p35_p0 = scmp.ne.s32.totalorder %s1116_s20, %s1112_s19 }
   0x8   : > { %p26_p1 = scmp.eq.s32.totalorder %s25_s26, 0  ;;  %p36_p2 = scmp.eq.s32.totalorder %s1120_s21, 0 }
   0x9   : > { %p41_p3 = scmp.ne.s32.totalorder %s1112_s19, %s1108_s18  ;;  %p42_p4 = scmp.eq.s32.totalorder %s1189_s22, 0 }
   0xa   : > { %s1205_s27 = scalar_select %p26_p1, %s1116_s20, %s28_s25  }
   0xb   : > { %p1207_p5 = por %p36_p2, %p35_p0  ;;  %p1211_p6 = por %p42_p4, %p41_p3 }
   0xc   : > { %p149_p7 = scmp.eq.s32.totalorder %s1189_s22, 1  ;;  %p155_p8 = scmp.eq.s32.totalorder %s815_s23, 1 }
   0xd   : > { %p887_p10 = scmp.lt.s32.totalorder %s1120_s21, 2  ;;  %s187_s7 = sand.u32 1, %s1116_s20  }
   0xe   : > { %p1218_p11 = por %p149_p7, %p35_p0  ;;  %p1222_p12 = por %p155_p8, %p41_p3 }
   0xf   : > { %s832_s8 = sshll.u32 %s1120_s21, 9  ;;  %s818_s9 = sshll.u32 %s187_s7, 5 }
  0x10   : > { %s1468_s30 = scalar_select %p1218_p11, 1, 0 }
  0x11   : > { %s1469_s6 = scalar_select %p1222_p12, 1, 0 }
  0x12   : > { %s1231_s12 = scalar_lea.hbm %s1459_s0, %s832_s8  ;;  %s191_s13 = scalar_lea.vmem [#allocation2], %s818_s9 }
  0x13   : > { %s199_s14 = sshll.u32 %s191_s13, 4  ;;  %p1235_p13 = pnand %p887_p10, %p1207_p5  ;;  %s1239_s14 = int_to_ptr.vmem [resolvable:$true] %s199_s14 }
  0x14   : > { %s188_s16 = scalar_lea.sflag [#allocation3], %s187_s7  ;;  %s1024_s17 = scalar_lea.hbm %s1231_s12, 512 }
  0x15   : > { %p1025_p2 = scmp.ne.s32.totalorder %s1231_s12, %s1024_s17  ;;  %p1026_p3 = pneg %p1235_p13 }
  0x16   : > { %s1029_s26 = scalar_lea.hbm %s1459_s0, 1024  ;;  %p1030_p5 = scmp.lt.u32.totalorder %s1231_s12, %s1459_s0 }
  0x17   : > { %p1027_p4 = pnand %p1026_p3, %p1025_p2  ;;  %p1031_p8 = scmp.lt.u32.totalorder %s1029_s26, %s1024_s17 }
  0x18   : > { %p1033_p9 = scmp.lt.u32.totalorder %s1024_s17, %s1231_s12 }
  0x19   : > { %p1028_p7 = pneg %p1027_p4  ;;  %p1032_p10 = por %p1031_p8, %p1030_p5 }
  0x1b   : > { %p1034_p0 = por %p1033_p9, %p1032_p10 }
  0x1d   : > { %p1035_p1 = pnand %p1034_p0, %p1028_p7 }
  0x1f   : > { %1038 = shalt.err (!%p1035_p1)
}
  0x20   : > { %s1039_s7 = scalar_lea.vmem %s1239_s14, 512  ;;  %s1122_s9 = smov [#allocation2]  }
  0x21   : > { %p1040_p2 = scmp.ne.s32.totalorder %s1239_s14, %s1039_s7  ;;  %s1044_s10 = sshll.u32 %s1122_s9, 4  ;;  %s1045_s10 = int_to_ptr.vmem [resolvable:$false] %s1044_s10 }
  0x22   : > { %s1046_s11 = scalar_lea.vmem %s1045_s10, 1024  ;;  %p1047_p11 = scmp.lt.s32.totalorder %s1239_s14, %s1045_s10 }
  0x23   : > { %p1042_p4 = pnand %p1040_p2, %p1026_p3  ;;  %p1048_p5 = scmp.lt.s32.totalorder %s1046_s11, %s1039_s7 }
  0x25   : > { %p1043_p12 = pneg %p1042_p4  ;;  %p1049_p8 = por %p1048_p5, %p1047_p11 }
  0x27   : > { %p1050_p9 = pnand %p1049_p8, %p1043_p12 }
  0x29   : > { %1053 = shalt.err (!%p1050_p9)
}
  0x2a   : > { %882 = dma.hbm_to_vmem [thread:$0]  (!%p1235_p13), %s1231_s12, 512, %s1239_s14, %s188_s16  }
  0x2b   : > { %p1471_p0 = scmp.lt.s32.totalorder %s1120_s21, 3  ;;  %p1472_p1 = scmp.ge.s32.totalorder %s1120_s21, 1 }
  0x2d   : > { %p205_p3 = pnand %p1472_p1, %p1471_p0 }
  0x2e   : > { %s1273_s13 = sand.u32 (!%p205_p3), 1, %s1112_s19  }
  0x2f   : > { %208 = sbr.rel (%p205_p3) target bundleno = 821 (0x335), region = 40  ;;  %s822_s17 = sshll.u32 (!%p205_p3), %s1273_s13, 5 }
  0x30   : > { %s211_s23 = scalar_lea.sflag (!%p205_p3), [#allocation3], %s1273_s13  ;;  %s214_s25 = scalar_lea.vmem (!%p205_p3), [#allocation2], %s822_s17 }
  0x36   : > { %1099 = dma.done.wait (%p1211_p6), %s211_s23, 512  }
  0x37   : > { %1101 = vsyncadd (%p1211_p6), %s211_s23, 4294966784  ;;  %v1123_v0 = vmov 0.0   ;;  %v243_v1 = vld [vmem:[%s214_s25 + $0x8] sm:$0xff]  ;;  %v244_v2 = vld [vmem:[%s214_s25 + $0x10] sm:$0xff]  ;;  %s1124_s12 = smov 126   ;;  %s1125_s14 = smov 127  }
  0x38   : > { %845 = vmatprep.subr.bf16.mxu1 %v1123_v0  ;;  %v940_v3 = vpack.i.bf16 %v244_v2, %v243_v1  ;;  %v242_v4 = vld [vmem:[%s214_s25] sm:$0xff]  ;;  %s1126_s15 = smov 110   ;;  %s1127_s29 = smov 108   ;;  %v245_v5 = vld [vmem:[%s214_s25 + $0x18] sm:$0xff]  ;;  %v1131_v7 = vmov 0   ;;  %vm1132_vm0 = vmmov 0  }
  0x39   : > { %s1128_s16 = smov 109   ;;  %s1129_s26 = smov 91   ;;  %v975_v6 = vpack.i.bf16 %v245_v5, %v242_v4  ;;  %417 = vmatprep.mubr.bf16.mxu0 %v1131_v7  ;;  %855 = vmatprep.mubr.msk.bf16.mxu1 %vm1132_vm0, %v1123_v0  ;;  %v1133_v8 = vmov 1   ;;  %v1307_v9 = vld [vmem:[%s1462_s3] sm:$0xff]  ;;  %vm255_vm1 = vcmask 1039360   ;;  %vm267_vm2 = vcmask 1031168  }
  0x3a   : > { %941 = vrot.lane.b32.xlu1 %v940_v3, %s1124_s12  ;;  %936 = vrot.lane.b32.xlu0 %v940_v3, %s1125_s14  ;;  %s1130_s28 = smov 92   ;;  %s1134_s8 = smov 90   ;;  %vm279_vm3 = vcmask 900096   ;;  %vm303_vm4 = vcmask 883712   ;;  %vm291_vm5 = vcmask 891904   ;;  %vm318_vm6 = vcmask 752640  }
  0x3b   : > { %980 = vset.pattern.permute.xlu0 %v1131_v7  ;;  %981 = vset.pattern.permute.xlu1 %v1133_v8  ;;  %vm333_vm7 = vcmask 744448   ;;  %vm348_vm8 = vcmask 736256   ;;  %vm375_vm9 = vcmask 1043456   ;;  %vm371_vm10 = vcmask 588800   ;;  %p1473_p11 = scmp.ne.s32.totalorder %s1468_s30, 0  ;;  %s1137_s9 = smov [#allocation5]  }
  0x3c   : > { %vm728_vm11 = vcmask 556032   ;;  %s1058_s10 = sshll.u32 %s1137_s9, 4  ;;  %s1059_s10 = int_to_ptr.vmem [resolvable:$false] %s1058_s10 }
  0x3d   : > { %s1060_s11 = scalar_lea.vmem %s1059_s10, 768 }
  0x3e   : > { %946 = vrot.lane.b32.xlu1 %v940_v3, %s1126_s15  ;;  %249 = vrot.lane.b32.xlu0 %v242_v4, %s1125_s14 }
  0x42   : > { %273 = vrot.lane.b32.xlu1 %v242_v4, %s1126_s15  ;;  %261 = vrot.lane.b32.xlu0 %v242_v4, %s1124_s12 }
  0x46   : > { %956 = vrot.lane.b32.xlu1 %v940_v3, %s1127_s29  ;;  %951 = vrot.lane.b32.xlu0 %v940_v3, %s1128_s16 }
  0x4a   : > { %297 = vrot.lane.b32.xlu1 %v242_v4, %s1127_s29  ;;  %285 = vrot.lane.b32.xlu0 %v242_v4, %s1128_s16 }
  0x4e   : > { %966 = vrot.lane.b32.xlu1 %v940_v3, %s1129_s26  ;;  %961 = vrot.lane.b32.xlu0 %v940_v3, %s1130_s28 }
  0x52   : > { %976 = vrot.lane.b32.xlu1 %v975_v6, %s1129_s26  ;;  %971 = vrot.lane.b32.xlu0 %v975_v6, %s1130_s28 }
  0x56   : > { %342 = vrot.lane.b32.xlu1 %v243_v1, %s1134_s8  ;;  %340 = vrot.lane.b32.xlu0 %v242_v4, %s1134_s8 }
  0x5a   : > { %346 = vrot.lane.b32.xlu1 %v245_v5, %s1134_s8  ;;  %344 = vrot.lane.b32.xlu0 %v244_v2, %s1134_s8 }
  0x5e   : > { %469 = vperm.xlu0 %980, %v1307_v9   ;;  %476 = vperm.xlu1 %981, %v1307_v9  }
  0xac   : > { %v942_v10 = vpop.permute.xlu1 %941  ;;  %v937_v11 = vpop.permute.xlu0 %936 }
  0xad   : > { %v944_v12 = vunpack.i.h.bf16 %v942_v10  ;;  %v943_v13 = vunpack.i.l.bf16 %v942_v10  ;;  %v939_v14 = vunpack.i.h.bf16 %v937_v11  ;;  %v938_v15 = vunpack.i.l.bf16 %v937_v11 }
  0xaf   : > { %v358_v16 = vpack.c.bf16 %v939_v14, %v244_v2  ;;  %v257_v17 = vsel %vm255_vm1, %v938_v15, %v939_v14  ;;  %v269_v24 = vsel %vm267_vm2, %v943_v13, %v944_v12 }
  0xb0   : > { %v947_v18 = vpop.permute.xlu1 %946  ;;  %v250_v19 = vpop.permute.xlu0 %249  ;;  %v357_v20 = vpack.c.bf16 %v257_v17, %v243_v1 }
  0xb1   : > { %v949_v21 = vunpack.i.h.bf16 %v947_v18  ;;  %v948_v22 = vunpack.i.l.bf16 %v947_v18  ;;  %v256_v23 = vsel %vm255_vm1, %v250_v19, %v938_v15  ;;  %846 = vmatpush3.bf16.msra.mxu1 %v358_v16 }
  0xb2   : > { %385 = vmatprep.subr.bf16.mxu0 %v357_v20  ;;  %847 = vmatprep.subr.bf16.mxu1 %v1123_v0  ;;  %v356_v25 = vpack.c.bf16 %v256_v23, %v242_v4 }
  0xb3   : > { %v361_v26 = vpack.c.bf16 %v949_v21, %v944_v12  ;;  %v281_v27 = vsel %vm279_vm3, %v948_v22, %v949_v21  ;;  %v355_v21 = vld [vmem:[%s1460_s1] sm:$0xf] }
  0xb4   : > { %v274_v28 = vpop.permute.xlu1 %273  ;;  %386 = vmatpush1.bf16.msra.mxu0 %v356_v25  ;;  %v262_v29 = vpop.permute.xlu0 %261  ;;  %v360_v30 = vpack.c.bf16 %v281_v27, %v269_v24 }
  0xb5   : > { %v280_v31 = vsel %vm279_vm3, %v274_v28, %v948_v22  ;;  %v268_v32 = vsel %vm267_vm2, %v262_v29, %v943_v13  ;;  %848 = vmatpush3.bf16.msra.mxu1 %v361_v26  ;;  %v487_v22 = vlaneseq  ;;  %v485_v29 = vld [vmem:[%s1463_s4] sm:$0x7] }
  0xb6   : > { %v359_v33 = vpack.c.bf16 %v280_v31, %v268_v32  ;;  %387 = vmatprep.subr.bf16.mxu0 %v360_v30  ;;  %849 = vmatprep.subr.bf16.mxu1 %v1123_v0 }
  0xb7   : > { %v488_v23 = vshrl.u32 %v487_v22, 7 }
  0xb8   : > { %v957_v34 = vpop.permute.xlu1 %956  ;;  %388 = vmatpush1.bf16.msra.mxu0 %v359_v33  ;;  %v952_v35 = vpop.permute.xlu0 %951 }
  0xb9   : > { %v959_v36 = vunpack.i.h.bf16 %v957_v34  ;;  %v958_v37 = vunpack.i.l.bf16 %v957_v34  ;;  %v954_v38 = vunpack.i.h.bf16 %v952_v35  ;;  %v953_v39 = vunpack.i.l.bf16 %v952_v35 }
  0xba   : > { %v489_v25 = vsub.s32 0, %v488_v23 }
  0xbb   : > { %v364_v40 = vpack.c.bf16 %v959_v36, %v954_v38  ;;  %v293_v41 = vsel %vm291_vm5, %v953_v39, %v954_v38  ;;  %v305_v42 = vsel %vm303_vm4, %v958_v37, %v959_v36 }
  0xbc   : > { %v298_v43 = vpop.permute.xlu1 %297  ;;  %v286_v44 = vpop.permute.xlu0 %285  ;;  %v363_v45 = vpack.c.bf16 %v305_v42, %v293_v41  ;;  %v493_v41 = vsub.s32 1, %v488_v23  ;;  %v497_v42 = vsub.s32 2, %v488_v23 }
  0xbd   : > { %v304_v46 = vsel %vm303_vm4, %v298_v43, %v958_v37  ;;  %v292_v47 = vsel %vm291_vm5, %v286_v44, %v953_v39  ;;  %850 = vmatpush3.bf16.msra.mxu1 %v364_v40  ;;  %v490_v37 = vrot.slane %v485_v29, %v489_v25 }
  0xbe   : > { %v362_v48 = vpack.c.bf16 %v304_v46, %v292_v47  ;;  %389 = vmatprep.subr.bf16.mxu0 %v363_v45  ;;  %851 = vmatprep.subr.bf16.mxu1 %v1123_v0  ;;  %v494_v46 = vrot.slane %v485_v29, %v493_v41  ;;  %v498_v47 = vrot.slane %v485_v29, %v497_v42 }
  0xc0   : > { %v967_v49 = vpop.permute.xlu1 %966  ;;  %v962_v50 = vpop.permute.xlu0 %961  ;;  %390 = vmatpush1.bf16.msra.mxu0 %v362_v48 }
  0xc1   : > { %v969_v51 = vunpack.i.h.bf16 %v967_v49  ;;  %v968_v52 = vunpack.i.l.bf16 %v967_v49  ;;  %v964_v53 = vunpack.i.h.bf16 %v962_v50  ;;  %v963_v54 = vunpack.i.l.bf16 %v962_v50 }
  0xc3   : > { %v320_v55 = vsel %vm318_vm6, %v963_v54, %v964_v53  ;;  %v335_v56 = vsel %vm333_vm7, %v968_v52, %v969_v51 }
  0xc4   : > { %v977_v57 = vpop.permute.xlu1 %976  ;;  %v972_v58 = vpop.permute.xlu0 %971  ;;  %v366_v59 = vpack.c.bf16 %v335_v56, %v320_v55  ;;  %v1136_v55 = vmov 3  }
  0xc5   : > { %v979_v60 = vunpack.i.h.bf16 %v977_v57  ;;  %v978_v61 = vunpack.i.l.bf16 %v977_v57  ;;  %v974_v62 = vunpack.i.h.bf16 %v972_v58  ;;  %v973_v63 = vunpack.i.l.bf16 %v972_v58  ;;  %1023 = vset.pattern.permute.xlu0 %v1136_v55 }
  0xc6   : > { %391 = vmatprep.subr.bf16.mxu0 %v366_v59 }
  0xc7   : > { %v319_v1 = vsel %vm318_vm6, %v973_v63, %v963_v54  ;;  %v334_v2 = vsel %vm333_vm7, %v978_v61, %v968_v52  ;;  %v321_v3 = vsel %vm318_vm6, %v964_v53, %v974_v62  ;;  %v336_v4 = vsel %vm333_vm7, %v969_v51, %v979_v60 }
  0xc8   : > { %v343_v5 = vpop.permute.xlu1 %342  ;;  %v341_v6 = vpop.permute.xlu0 %340  ;;  %v365_v8 = vpack.c.bf16 %v334_v2, %v319_v1  ;;  %v367_v10 = vpack.c.bf16 %v336_v4, %v321_v3  ;;  %v1135_v54 = vmov 2  }
  0xc9   : > { %v1331_v11 = vsel %vm348_vm8, %v341_v6, %v343_v5  ;;  %1022 = vset.pattern.permute.xlu1 %v1135_v54 }
  0xca   : > { %392 = vmatpush1.bf16.msra.mxu0 %v365_v8  ;;  %852 = vmatpush3.bf16.msra.mxu1 %v367_v10  ;;  %v368_v12 = vpack.c.bf16 %v1331_v11, %v1331_v11 }
  0xcb   : > { %853 = vmatprep.subr.bf16.mxu1 %v1123_v0 }
  0xcc   : > { %v347_v13 = vpop.permute.xlu1 %346  ;;  %v1336_v14 = vpop.permute.xlu0 %344  ;;  %v377_v19 = vsel %vm375_vm9, %v368_v12, 0 }
  0xcd   : > { %v1340_v15 = vsel %vm348_vm8, %v343_v5, %v1336_v14  ;;  %v351_v16 = vsel %vm348_vm8, %v1336_v14, %v347_v13 }
  0xce   : > { %v369_v17 = vpack.c.bf16 %v1340_v15, %v1340_v15  ;;  %v370_v18 = vpack.c.bf16 %v351_v16, %v351_v16 }
  0xd0   : > { %823 = vmatprep.subr.msk.bf16.mxu0 %vm375_vm9, %v369_v17  ;;  %v383_v20 = vsel %vm375_vm9, %v370_v18, 0 }
  0xd1   : > { %394 = vmatpush1.bf16.msra.mxu0 %v377_v19  ;;  %854 = vmatpush3.bf16.msra.mxu1 %v383_v20 }
  0xd2   : > { %859 = vmatprep.subr.bf16.mxu1 %v1123_v0 }
  0xd4   : > { %824 = vmatmul.mubr.msk.bf16.vlgmr.msra.gmra.mrb[0].mxu0 %vm371_vm10, %v355_v21  ;;  %856 = vmatmul.mubr.msk.bf16.vlgmr.msra.gmra.mrb[0].mxu1 %vm371_vm10, %v355_v21 }
  0xd5   : > { %869 = vmatprep.mubr.msk.bf16.mxu1 %vm1132_vm0, %v1123_v0  ;;  %656 = vmatprep.mubr.bf16.mxu0 %v1131_v7 }
  0xdd   : > { %v470_v24 = vpop.permute.xlu0 %469  ;;  %v477_v26 = vpop.permute.xlu1 %476 }
 0x1a7   : > { %v419_v27 = vpop.f32.mrb[0].mxu0  ;;  %v460_v28 = vpop.f32.mrb[0].mxu1 }
 0x1a8   : > { %v472_v30 = vmul.f32 %v470_v24, %v419_v27  ;;  %v421_v31 = vpop.f32.mrb[1].mxu0  ;;  %v857_v32 = vpop.f32.mrb[1].mxu1  ;;  %v474_v35 = vmul.f32 %v470_v24, %v460_v28 }
 0x1a9   : > { %v423_v33 = vpop.f32.mrb[2].mxu0  ;;  %v463_v34 = vpop.f32.mrb[2].mxu1  ;;  %v473_v36 = vmul.f32 %v470_v24, %v421_v31 }
 0x1aa   : > { %v479_v7 = vadd.f32 %v477_v26, %v472_v30  ;;  %v424_v38 = vpop.f32.mrb[3].mxu0  ;;  %v858_v39 = vpop.f32.mrb[3].mxu1  ;;  %v481_v44 = vadd.f32 %v477_v26, %v474_v35 }
 0x1ab   : > { %v480_v43 = vadd.f32 %v477_v26, %v473_v36 }
 0x1ac   : > { %v482_v40 = vmax.f32 %v479_v7, 0.0  ;;  %v484_v49 = vmax.f32 %v481_v44, 0.0 }
 0x1ad   : > { %v483_v48 = vmax.f32 %v480_v43, 0.0 }
 0x1ae   : > { %v502_v45 = vmul.f32 %v490_v37, %v482_v40  ;;  %v504_v51 = vmul.f32 %v498_v47, %v484_v49 }
 0x1af   : > { %v503_v50 = vmul.f32 %v494_v46, %v483_v48 }
 0x1b0   : > { %519 = vrot.lane.b32.xlu1 %v502_v45, %s1124_s12  ;;  %508 = vrot.lane.b32.xlu0 %v502_v45, %s1125_s14 }
 0x1b1   : > { %v982_v52 = vpack.i.bf16 %v504_v51, %v503_v50  ;;  %v1017_v53 = vpack.i.bf16 %v503_v50, %v502_v45 }
 0x1b4   : > { %541 = vrot.lane.b32.xlu1 %v502_v45, %s1128_s16  ;;  %530 = vrot.lane.b32.xlu0 %v502_v45, %s1126_s15 }
 0x1b8   : > { %563 = vrot.lane.b32.xlu1 %v502_v45, %s1130_s28  ;;  %552 = vrot.lane.b32.xlu0 %v502_v45, %s1127_s29 }
 0x1bc   : > { %574 = vrot.lane.b32.xlu0 %v502_v45, %s1129_s26  ;;  %983 = vrot.lane.b32.xlu1 %v982_v52, %s1125_s14  ;;  %s873_s14 = smul.u32 24, %s1273_s13 }
 0x1c0   : > { %993 = vrot.lane.b32.xlu0 %v982_v52, %s1126_s15  ;;  %988 = vrot.lane.b32.xlu1 %v982_v52, %s1124_s12  ;;  %s874_s15 = smul.u32 384, %s1189_s22  ;;  %s731_s22 = scalar_lea.sflag [#allocation4], %s1273_s13 }
 0x1c4   : > { %1003 = vrot.lane.b32.xlu0 %v982_v52, %s1127_s29  ;;  %998 = vrot.lane.b32.xlu1 %v982_v52, %s1128_s16  ;;  %s240_s29 = scalar_lea.vmem [#allocation5], %s873_s14 }
 0x1c5   : > { %s745_s16 = sshll.u32 %s240_s29, 4  ;;  %s1417_s16 = int_to_ptr.vmem [resolvable:$true] %s745_s16 }
 0x1c6   : > { %s1054_s7 = scalar_lea.vmem %s1417_s16, 384  ;;  %p1061_p7 = scmp.lt.s32.totalorder %s1417_s16, %s1059_s10 }
 0x1c7   : > { %p1055_p6 = scmp.ne.s32.totalorder %s1417_s16, %s1054_s7  ;;  %p1062_p10 = scmp.lt.s32.totalorder %s1060_s11, %s1054_s7 }
 0x1c8   : > { %1013 = vrot.lane.b32.xlu0 %v982_v52, %s1129_s26  ;;  %1008 = vrot.lane.b32.xlu1 %v982_v52, %s1130_s28 }
 0x1c9   : > { %p1056_p12 = pnand %p1055_p6, %p1473_p11  ;;  %p1063_p2 = por %p1062_p10, %p1061_p7 }
 0x1cb   : > { %p1057_p13 = pneg %p1056_p12 }
 0x1cc   : > { %589 = vrot.lane.b32.xlu0 %v504_v51, %s1134_s8  ;;  %1018 = vrot.lane.b32.xlu1 %v1017_v53, %s1134_s8  ;;  %s1415_s8 = scalar_lea.hbm %s1464_s5, %s874_s15 }
 0x1cd   : > { %p1064_p4 = pnand %p1063_p2, %p1057_p13 }
 0x1d0   : > { %706 = vperm.xlu1 %1022, %v1307_v9   ;;  %713 = vperm.xlu0 %1023, %v1307_v9  }
 0x222   : > { %v520_v56 = vpop.permute.xlu1 %519  ;;  %v509_v57 = vpop.permute.xlu0 %508 }
 0x226   : > { %v542_v58 = vpop.permute.xlu1 %541  ;;  %v531_v59 = vpop.permute.xlu0 %530 }
 0x22a   : > { %v564_v60 = vpop.permute.xlu1 %563  ;;  %v553_v61 = vpop.permute.xlu0 %552 }
 0x22e   : > { %v575_v62 = vpop.permute.xlu0 %574  ;;  %v984_v63 = vpop.permute.xlu1 %983 }
 0x22f   : > { %v986_v1 = vunpack.i.h.bf16 %v984_v63  ;;  %v985_v2 = vunpack.i.l.bf16 %v984_v63 }
 0x231   : > { %v599_v3 = vpack.c.bf16 %v986_v1, %v504_v51  ;;  %v514_v4 = vsel %vm255_vm1, %v509_v57, %v985_v2  ;;  %v515_v5 = vsel %vm255_vm1, %v985_v2, %v986_v1 }
 0x232   : > { %v597_v6 = vpack.c.bf16 %v514_v4, %v502_v45  ;;  %v994_v8 = vpop.permute.xlu0 %993  ;;  %v989_v10 = vpop.permute.xlu1 %988  ;;  %v598_v12 = vpack.c.bf16 %v515_v5, %v503_v50 }
 0x233   : > { %v996_v9 = vunpack.i.h.bf16 %v994_v8  ;;  %v995_v13 = vunpack.i.l.bf16 %v994_v8  ;;  %v991_v16 = vunpack.i.h.bf16 %v989_v10  ;;  %v990_v17 = vunpack.i.l.bf16 %v989_v10  ;;  %860 = vmatpush3.bf16.msra.mxu1 %v599_v3 }
 0x234   : > { %624 = vmatprep.subr.bf16.mxu0 %v598_v12  ;;  %861 = vmatprep.subr.bf16.mxu1 %v1123_v0 }
 0x235   : > { %v536_v18 = vsel %vm279_vm3, %v531_v59, %v995_v13  ;;  %v602_v19 = vpack.c.bf16 %v996_v9, %v991_v16  ;;  %v525_v20 = vsel %vm267_vm2, %v520_v56, %v990_v17  ;;  %625 = vmatpush1.bf16.msra.mxu0 %v597_v6  ;;  %v526_v21 = vsel %vm267_vm2, %v990_v17, %v991_v16 }
 0x236   : > { %v600_v22 = vpack.c.bf16 %v536_v18, %v525_v20  ;;  %v1004_v23 = vpop.permute.xlu0 %1003  ;;  %v999_v24 = vpop.permute.xlu1 %998  ;;  %v537_v25 = vsel %vm279_vm3, %v995_v13, %v996_v9 }
 0x237   : > { %v1006_v26 = vunpack.i.h.bf16 %v1004_v23  ;;  %v1005_v27 = vunpack.i.l.bf16 %v1004_v23  ;;  %v1001_v28 = vunpack.i.h.bf16 %v999_v24  ;;  %v1000_v29 = vunpack.i.l.bf16 %v999_v24  ;;  %862 = vmatpush3.bf16.msra.mxu1 %v602_v19 }
 0x238   : > { %v601_v30 = vpack.c.bf16 %v537_v25, %v526_v21  ;;  %863 = vmatprep.subr.bf16.mxu1 %v1123_v0 }
 0x239   : > { %v558_v31 = vsel %vm303_vm4, %v553_v61, %v1005_v27  ;;  %v605_v32 = vpack.c.bf16 %v1006_v26, %v1001_v28  ;;  %v547_v33 = vsel %vm291_vm5, %v542_v58, %v1000_v29  ;;  %v548_v34 = vsel %vm291_vm5, %v1000_v29, %v1001_v28 }
 0x23a   : > { %v603_v35 = vpack.c.bf16 %v558_v31, %v547_v33  ;;  %626 = vmatprep.subr.bf16.mxu0 %v601_v30  ;;  %v1014_v36 = vpop.permute.xlu0 %1013  ;;  %v1009_v37 = vpop.permute.xlu1 %1008  ;;  %v559_v7 = vsel %vm303_vm4, %v1005_v27, %v1006_v26 }
 0x23b   : > { %627 = vmatpush1.bf16.msra.mxu0 %v600_v22  ;;  %v1016_v38 = vunpack.i.h.bf16 %v1014_v36  ;;  %v1015_v39 = vunpack.i.l.bf16 %v1014_v36  ;;  %v1011_v40 = vunpack.i.h.bf16 %v1009_v37  ;;  %v1010_v41 = vunpack.i.l.bf16 %v1009_v37  ;;  %864 = vmatpush3.bf16.msra.mxu1 %v605_v32 }
 0x23c   : > { %v604_v42 = vpack.c.bf16 %v559_v7, %v548_v34  ;;  %865 = vmatprep.subr.bf16.mxu1 %v1123_v0 }
 0x23d   : > { %v580_v43 = vsel %vm333_vm7, %v575_v62, %v1015_v39  ;;  %v608_v44 = vpack.c.bf16 %v1016_v38, %v1011_v40  ;;  %v569_v45 = vsel %vm318_vm6, %v564_v60, %v1010_v41  ;;  %v570_v46 = vsel %vm318_vm6, %v1010_v41, %v1011_v40  ;;  %v596_v60 = vld [vmem:[%s1461_s2] sm:$0xf] }
 0x23e   : > { %v606_v47 = vpack.c.bf16 %v580_v43, %v569_v45  ;;  %628 = vmatprep.subr.bf16.mxu0 %v604_v42  ;;  %v590_v48 = vpop.permute.xlu0 %589  ;;  %v1019_v49 = vpop.permute.xlu1 %1018  ;;  %v581_v50 = vsel %vm333_vm7, %v1015_v39, %v1016_v38 }
 0x23f   : > { %629 = vmatpush1.bf16.msra.mxu0 %v603_v35  ;;  %v611_v51 = vpack.c.bf16 %v590_v48, %v590_v48  ;;  %v1021_v52 = vunpack.i.h.bf16 %v1019_v49  ;;  %v1020_v53 = vunpack.i.l.bf16 %v1019_v49  ;;  %866 = vmatpush3.bf16.msra.mxu1 %v608_v44  ;;  %v607_v54 = vpack.c.bf16 %v581_v50, %v570_v46 }
 0x240   : > { %867 = vmatprep.subr.bf16.mxu1 %v1123_v0 }
 0x241   : > { %v592_v55 = vsel %vm348_vm8, %v1021_v52, %v590_v48  ;;  %630 = vmatprep.subr.bf16.mxu0 %v607_v54  ;;  %v622_v56 = vsel %vm375_vm9, %v611_v51, 0  ;;  %v591_v57 = vsel %vm348_vm8, %v1020_v53, %v1021_v52 }
 0x242   : > { %v610_v58 = vpack.c.bf16 %v592_v55, %v592_v55  ;;  %v609_v59 = vpack.c.bf16 %v591_v57, %v591_v57 }
 0x243   : > { %631 = vmatpush1.bf16.msra.mxu0 %v606_v47  ;;  %868 = vmatpush3.bf16.msra.mxu1 %v622_v56 }
 0x244   : > { %826 = vmatprep.subr.msk.bf16.mxu0 %vm375_vm9, %v610_v58  ;;  %v616_v0 = vsel %vm375_vm9, %v609_v59, 0 }
 0x246   : > { %870 = vmatmul.mubr.msk.bf16.vlgmr.msra.gmra.mrb[4].mxu1 %vm371_vm10, %v596_v60 }
 0x247   : > { %633 = vmatpush1.bf16.msra.mxu0 %v616_v0 }
 0x24a   : > { %827 = vmatmul.mubr.msk.bf16.vlgmr.msra.gmra.mrb[4].mxu0 %vm371_vm10, %v596_v60 }
 0x24f   : > { %v707_v61 = vpop.permute.xlu1 %706  ;;  %v714_v63 = vpop.permute.xlu0 %713 }
 0x319   : > { %v699_v62 = vpop.f32.mrb[4].mxu1 }
 0x31a   : > { %v711_v1 = vmul.f32 %v707_v61, %v699_v62  ;;  %v871_v2 = vpop.f32.mrb[5].mxu1 }
 0x31b   : > { %v702_v3 = vpop.f32.mrb[6].mxu1 }
 0x31c   : > { %v718_v4 = vadd.f32 %v714_v63, %v711_v1  ;;  %v872_v5 = vpop.f32.mrb[7].mxu1 }
 0x31d   : > { %v658_v6 = vpop.f32.mrb[4].mxu0 }
 0x31e   : > { %v722_v8 = vadd.f32 %v718_v4, %v1336_v14  ;;  %v709_v10 = vmul.f32 %v707_v61, %v658_v6  ;;  %v660_v12 = vpop.f32.mrb[5].mxu0 }
 0x31f   : > { %v710_v9 = vmul.f32 %v707_v61, %v660_v12  ;;  %v662_v13 = vpop.f32.mrb[6].mxu0 }
 0x320   : > { %v725_v16 = vmax.f32 %v722_v8, 0.0  ;;  %v716_v17 = vadd.f32 %v714_v63, %v709_v10  ;;  %v663_v18 = vpop.f32.mrb[7].mxu0 }
 0x321   : > { %v717_v19 = vadd.f32 %v714_v63, %v710_v9 }
 0x322   : > { %v720_v20 = vadd.f32 %v716_v17, %v1331_v11  ;;  %729 = vst.msk [vmem:[%s240_s29 + $0x10] sm:$0xff] %vm728_vm11, %v725_v16 }
 0x323   : > { %v721_v21 = vadd.f32 %v717_v19, %v1340_v15 }
 0x324   : > { %v723_v14 = vmax.f32 %v720_v20, 0.0 }
 0x325   : > { %v724_v22 = vmax.f32 %v721_v21, 0.0 }
 0x326   : > { %726 = vst [vmem:[%s240_s29] sm:$0xff] %v723_v14 }
 0x327   : > { %727 = vst [vmem:[%s240_s29 + $0x8] sm:$0xff] %v724_v22 }
 0x328   : > { %1067 = shalt.err (!%p1064_p4)
}
 0x329   : > { %s1068_s13 = scalar_lea.hbm %s1415_s8, 384  ;;  %s1072_s25 = scalar_lea.hbm %s1464_s5, 768 }
 0x32a   : > { %p1069_p5 = scmp.ne.s32.totalorder %s1415_s8, %s1068_s13  ;;  %p1073_p0 = scmp.lt.u32.totalorder %s1415_s8, %s1464_s5 }
 0x32b   : > { %p1074_p1 = scmp.lt.u32.totalorder %s1072_s25, %s1068_s13  ;;  %p1076_p6 = scmp.lt.u32.totalorder %s1068_s13, %s1415_s8 }
 0x32c   : > { %p1070_p8 = pnand %p1069_p5, %p1473_p11 }
 0x32d   : > { %p1075_p3 = por %p1074_p1, %p1073_p0 }
 0x32e   : > { %p1071_p9 = pneg %p1070_p8 }
 0x32f   : > { %p1077_p12 = por %p1076_p6, %p1075_p3 }
 0x331   : > { %p1078_p13 = pnand %p1077_p12, %p1071_p9 }
 0x333   : > { %1081 = shalt.err (!%p1078_p13)
}
 0x334   : > { %877 = dma.vmem_to_hbm [thread:$0]  (%p1473_p11), %s1417_s16, 384, %s1415_s8, %s731_s22  }
 0x335 PF: > { %s757_s15 = sand.u32 1, %s1108_s18   ;;  %p1474_p7 = scmp.ne.s32.totalorder %s1469_s6, 0 }
 0x336   : > { %p1475_p10 = scmp.ge.s32.totalorder %s1120_s21, 2  ;;  %s758_s29 = scalar_lea.sflag [#allocation4], %s757_s15 }
 0x338   : > { %p884_p2 = pnand %p1475_p10, %p1474_p7 }
 0x33a   : > { %1103 = dma.done.wait (!%p884_p2), %s758_s29, 384  }
 0x33b   : > { %1105 = vsyncadd (!%p884_p2), %s758_s29, 4294966912  ;;  %p18_p4 = scmp.ge.s32.totalorder %s1193_s24, 4   ;;  %s1476_s18 = smov %s1112_s19 }
 0x33c   : > { %s1477_s19 = smov %s1116_s20  ;;  %s1478_s20 = smov %s1205_s27 }
 0x33d   : > { %s1479_s21 = smov %s1193_s24  ;;  %20 = sbr.rel (!%p18_p4) target bundleno = 5 (0x5), region = 85 }
 0x344   :  { %763 = vsyncpa [#allocation3], 1 }
 0x345   :  { %765 = vsyncpa [#allocation3 + $0x1], 1 }
 0x346   :  { %766 = vsyncpa [#allocation4], 1 }
 0x347   :  { %768 = vsyncpa [#allocation4 + $0x1], 1 }

</bundles_post_ra>
